<compile_context>
chip_gen: v5e
topology: v5e:2x2
jax: 0.10.0
libtpu: 0.0.40
codegen_flags: <defaults>
</compile_context>

<pallas_src>
import functools

import jax
import jax.numpy as jnp
from jax.experimental import pallas as pl
from jax.experimental.pallas import tpu as pltpu


_ROW_TILE = 256                    # rows of the flattened (batch*tokens) axis per grid step
_VMEM_LIMIT = 32 * 1024 * 1024     # explicit scoped-VMEM budget (safe on v5e/v6e/v7x)


# ----------------------------- tiling helpers -----------------------------

def _row_plan(M):
    """Return (tile_rows, num_tiles, padded_rows) for the flattened row axis."""
    if M <= _ROW_TILE:
        return M, 1, M
    Mp = ((M + _ROW_TILE - 1) // _ROW_TILE) * _ROW_TILE
    return _ROW_TILE, Mp // _ROW_TILE, Mp


def _pad_rows(x, Mp):
    M = x.shape[0]
    if Mp == M:
        return x
    return jnp.pad(x, ((0, Mp - M), (0, 0)))


def _hidden_tile(H):
    """Tile size for the MLP hidden dim (multiple of 128 that divides H, or full)."""
    if H <= 512:
        return H
    for t in (512, 384, 256, 128):
        if H % t == 0:
            return t
    return H


def _ln_f32(x, g, b, eps):
    """LayerNorm in f32 (VPU math stays f32; callers narrow at the MXU boundary)."""
    xv = x.astype(jnp.float32)
    mu = jnp.mean(xv, axis=-1, keepdims=True)
    var = jnp.mean(jnp.square(xv - mu), axis=-1, keepdims=True)
    y = (xv - mu) * jax.lax.rsqrt(var + eps)
    return y * g.astype(jnp.float32) + b.astype(jnp.float32)


# ----------------------------- Pallas kernels -----------------------------

def _linear_kernel(x_ref, w_ref, o_ref):
    # bias-free matmul (patch embedding); bf16 MXU inputs, f32 accumulation.
    o_ref[...] = jnp.dot(x_ref[...].astype(jnp.bfloat16), w_ref[...],
                         preferred_element_type=jnp.float32).astype(o_ref.dtype)


def _ln_kernel(x_ref, g_ref, b_ref, o_ref, *, eps):
    o_ref[...] = _ln_f32(x_ref[...], g_ref[...], b_ref[...], eps).astype(o_ref.dtype)


def _ln_linear_bias_kernel(x_ref, g_ref, b_ref, w_ref, bias_ref, o_ref, *, eps):
    # LN (f32) -> bf16 -> matmul (+bias).  Fused LN1 + QKV projection.
    y = _ln_f32(x_ref[...], g_ref[...], b_ref[...], eps).astype(jnp.bfloat16)
    acc = jnp.dot(y, w_ref[...], preferred_element_type=jnp.float32)
    o_ref[...] = (acc + bias_ref[...].astype(jnp.float32)).astype(o_ref.dtype)


def _ln_linear_kernel(x_ref, g_ref, b_ref, w_ref, o_ref, *, eps):
    # LN + bias-free projection (ln_post on the CLS token + final proj).
    y = _ln_f32(x_ref[...], g_ref[...], b_ref[...], eps).astype(jnp.bfloat16)
    o_ref[...] = jnp.dot(y, w_ref[...],
                         preferred_element_type=jnp.float32).astype(o_ref.dtype)


def _linear_bias_residual_kernel(y_ref, w_ref, bias_ref, res_ref, o_ref):
    # attention out-projection + bias + residual add, fused into one pass.
    acc = jnp.dot(y_ref[...].astype(jnp.bfloat16), w_ref[...],
                  preferred_element_type=jnp.float32)
    out = acc + bias_ref[...].astype(jnp.float32) + res_ref[...].astype(jnp.float32)
    o_ref[...] = out.astype(o_ref.dtype)


def _attn_kernel(qkv_ref, o_ref, *, heads, hd, scale):
    # One batch element per grid step; all heads computed in-kernel (lane-dense
    # (L, d) output store; no HBM head transposes).
    # qkv_ref: (1, L, 3*d) bf16, o_ref: (1, L, d) bf16.
    x = qkv_ref[0]                              # (L, 3d)
    d = heads * hd
    outs = []
    for h in range(heads):                      # static unroll over heads
        q = x[:, h * hd:(h + 1) * hd]
        k = x[:, d + h * hd: d + (h + 1) * hd]
        v = x[:, 2 * d + h * hd: 2 * d + (h + 1) * hd]
        # contract head_dim directly (no in-kernel k.T transpose)
        s = jax.lax.dot_general(q, k, (((1,), (1,)), ((), ())),
                                preferred_element_type=jnp.float32)   # (L, L) f32
        s = s * scale
        s = s - jnp.max(s, axis=-1, keepdims=True)
        p = jnp.exp(s)
        p = p * pl.reciprocal(jnp.sum(p, axis=-1, keepdims=True), approx=True)
        outs.append(jnp.dot(p.astype(jnp.bfloat16), v,
                            preferred_element_type=jnp.float32))
    o_ref[0] = jnp.concatenate(outs, axis=-1).astype(o_ref.dtype)


def _ln_mlp_residual_kernel(x_ref, g_ref, b_ref, w1_ref, b1_ref, w2_ref, b2_ref,
                            o_ref, acc_ref, lnx_ref, *, eps):
    # Fused LN2 -> c_fc -> QuickGELU -> c_proj -> +residual, tiled over hidden dim.
    k = pl.program_id(1)

    @pl.when(k == 0)
    def _():
        lnx_ref[...] = _ln_f32(x_ref[...], g_ref[...], b_ref[...], eps
                               ).astype(lnx_ref.dtype)      # bf16 MXU feed (reused every k)
        acc_ref[...] = jnp.zeros_like(acc_ref)

    h = jnp.dot(lnx_ref[...], w1_ref[...], preferred_element_type=jnp.float32)
    h = h + b1_ref[...].astype(jnp.float32)
    # QuickGELU in f32: x * sigmoid(1.702 x); reciprocal rides the EUP slot.
    h = h * pl.reciprocal(1.0 + jnp.exp(-1.702 * h), approx=True)
    acc_ref[...] += jnp.dot(h.astype(jnp.bfloat16), w2_ref[...],
                            preferred_element_type=jnp.float32)

    @pl.when(k == pl.num_programs(1) - 1)
    def _():
        out = acc_ref[...] + b2_ref[...].astype(jnp.float32) \
              + x_ref[...].astype(jnp.float32)
        o_ref[...] = out.astype(o_ref.dtype)


# ----------------------------- Pallas wrappers -----------------------------

def pallas_linear(x, w):
    """x: (M, K) f32, w: (K, N) bf16 -> (M, N) f32 (no bias)."""
    M, K = x.shape
    N = w.shape[1]
    tm, gm, Mp = _row_plan(M)
    xp = _pad_rows(x, Mp)
    out = pl.pallas_call(
        _linear_kernel,
        out_shape=jax.ShapeDtypeStruct((Mp, N), jnp.float32),
        grid=(gm,),
        in_specs=[pl.BlockSpec((tm, K), lambda i: (i, 0)),
                  pl.BlockSpec((K, N), lambda i: (0, 0))],
        out_specs=pl.BlockSpec((tm, N), lambda i: (i, 0)),
        compiler_params=pltpu.CompilerParams(
            dimension_semantics=("parallel",), vmem_limit_bytes=_VMEM_LIMIT),
    )(xp, w)
    return out[:M] if Mp != M else out


def pallas_layernorm(x, gamma, beta, eps=1e-5):
    """x: (M, D) f32 -> (M, D) f32."""
    M, D = x.shape
    tm, gm, Mp = _row_plan(M)
    xp = _pad_rows(x, Mp)
    out = pl.pallas_call(
        functools.partial(_ln_kernel, eps=eps),
        out_shape=jax.ShapeDtypeStruct((Mp, D), jnp.float32),
        grid=(gm,),
        in_specs=[pl.BlockSpec((tm, D), lambda i: (i, 0)),
                  pl.BlockSpec((1, D), lambda i: (0, 0)),
                  pl.BlockSpec((1, D), lambda i: (0, 0))],
        out_specs=pl.BlockSpec((tm, D), lambda i: (i, 0)),
        compiler_params=pltpu.CompilerParams(dimension_semantics=("parallel",)),
    )(xp, gamma.reshape(1, D), beta.reshape(1, D))
    return out[:M] if Mp != M else out


def pallas_ln_linear_bias(x, gamma, beta, w, bias, eps=1e-5):
    """Fused LN + (x @ w + bias).  x f32, w bf16; output bf16 (feeds the MXU next)."""
    M, D = x.shape
    N = w.shape[1]
    tm, gm, Mp = _row_plan(M)
    xp = _pad_rows(x, Mp)
    out = pl.pallas_call(
        functools.partial(_ln_linear_bias_kernel, eps=eps),
        out_shape=jax.ShapeDtypeStruct((Mp, N), jnp.bfloat16),
        grid=(gm,),
        in_specs=[pl.BlockSpec((tm, D), lambda i: (i, 0)),
                  pl.BlockSpec((1, D), lambda i: (0, 0)),
                  pl.BlockSpec((1, D), lambda i: (0, 0)),
                  pl.BlockSpec((D, N), lambda i: (0, 0)),
                  pl.BlockSpec((1, N), lambda i: (0, 0))],
        out_specs=pl.BlockSpec((tm, N), lambda i: (i, 0)),
        compiler_params=pltpu.CompilerParams(
            dimension_semantics=("parallel",), vmem_limit_bytes=_VMEM_LIMIT),
    )(xp, gamma.reshape(1, D), beta.reshape(1, D), w, bias.reshape(1, N))
    return out[:M] if Mp != M else out


def pallas_ln_linear(x, gamma, beta, w, eps=1e-5):
    """Fused LN + bias-free projection (ln_post + proj).  Output f32."""
    M, D = x.shape
    N = w.shape[1]
    tm, gm, Mp = _row_plan(M)
    xp = _pad_rows(x, Mp)
    out = pl.pallas_call(
        functools.partial(_ln_linear_kernel, eps=eps),
        out_shape=jax.ShapeDtypeStruct((Mp, N), jnp.float32),
        grid=(gm,),
        in_specs=[pl.BlockSpec((tm, D), lambda i: (i, 0)),
                  pl.BlockSpec((1, D), lambda i: (0, 0)),
                  pl.BlockSpec((1, D), lambda i: (0, 0)),
                  pl.BlockSpec((D, N), lambda i: (0, 0))],
        out_specs=pl.BlockSpec((tm, N), lambda i: (i, 0)),
        compiler_params=pltpu.CompilerParams(
            dimension_semantics=("parallel",), vmem_limit_bytes=_VMEM_LIMIT),
    )(xp, gamma.reshape(1, D), beta.reshape(1, D), w)
    return out[:M] if Mp != M else out


def pallas_linear_bias_residual(y, w, bias, residual):
    """residual + (y @ w + bias).  y bf16, residual f32, output f32."""
    M, K = y.shape
    N = w.shape[1]
    tm, gm, Mp = _row_plan(M)
    yp = _pad_rows(y, Mp)
    rp = _pad_rows(residual, Mp)
    out = pl.pallas_call(
        _linear_bias_residual_kernel,
        out_shape=jax.ShapeDtypeStruct((Mp, N), jnp.float32),
        grid=(gm,),
        in_specs=[pl.BlockSpec((tm, K), lambda i: (i, 0)),
                  pl.BlockSpec((K, N), lambda i: (0, 0)),
                  pl.BlockSpec((1, N), lambda i: (0, 0)),
                  pl.BlockSpec((tm, N), lambda i: (i, 0))],
        out_specs=pl.BlockSpec((tm, N), lambda i: (i, 0)),
        compiler_params=pltpu.CompilerParams(
            dimension_semantics=("parallel",), vmem_limit_bytes=_VMEM_LIMIT),
    )(yp, w, bias.reshape(1, N), rp)
    return out[:M] if Mp != M else out


def pallas_attention(qkv, heads):
    """qkv: (B, L, 3*d) bf16 -> (B, L, d) bf16.  One batch element per grid step,
    all heads handled in-kernel (no HBM head transposes)."""
    B, L, threed = qkv.shape
    d = threed // 3
    hd = d // heads
    assert hd * heads == d
    kernel = functools.partial(_attn_kernel, heads=heads, hd=hd,
                               scale=1.0 / (hd ** 0.5))
    return pl.pallas_call(
        kernel,
        out_shape=jax.ShapeDtypeStruct((B, L, d), jnp.bfloat16),
        grid=(B,),
        in_specs=[pl.BlockSpec((1, L, threed), lambda b: (b, 0, 0))],
        out_specs=pl.BlockSpec((1, L, d), lambda b: (b, 0, 0)),
        compiler_params=pltpu.CompilerParams(
            dimension_semantics=("parallel",), vmem_limit_bytes=_VMEM_LIMIT),
    )(qkv)


def pallas_ln_mlp_residual(x, gamma, beta, w1, b1, w2, b2, eps=1e-5):
    """x + c_proj(QuickGELU(c_fc(LN2(x)))).  Hidden dim tiled + f32 accumulator."""
    M, D = x.shape
    H = w1.shape[1]
    tm, gm, Mp = _row_plan(M)
    th = _hidden_tile(H)
    gh = H // th
    xp = _pad_rows(x, Mp)
    out = pl.pallas_call(
        functools.partial(_ln_mlp_residual_kernel, eps=eps),
        out_shape=jax.ShapeDtypeStruct((Mp, D), jnp.float32),
        grid=(gm, gh),
        in_specs=[pl.BlockSpec((tm, D), lambda i, k: (i, 0)),
                  pl.BlockSpec((1, D), lambda i, k: (0, 0)),
                  pl.BlockSpec((1, D), lambda i, k: (0, 0)),
                  pl.BlockSpec((D, th), lambda i, k: (0, k)),
                  pl.BlockSpec((1, th), lambda i, k: (0, k)),
                  pl.BlockSpec((th, D), lambda i, k: (k, 0)),
                  pl.BlockSpec((1, D), lambda i, k: (0, 0))],
        out_specs=pl.BlockSpec((tm, D), lambda i, k: (i, 0)),
        scratch_shapes=[pltpu.VMEM((tm, D), jnp.float32),
                        pltpu.VMEM((tm, D), jnp.bfloat16)],
        compiler_params=pltpu.CompilerParams(
            dimension_semantics=("parallel", "arbitrary"),
            vmem_limit_bytes=_VMEM_LIMIT),
    )(xp, gamma.reshape(1, D), beta.reshape(1, D),
      w1, b1.reshape(1, H), w2, b2.reshape(1, D))
    return out[:M] if Mp != M else out


# ----------------------------- Model forward -----------------------------

def residual_attention_block(x2d, p, *, B, L, heads):
    """x2d: (B*L, d) f32, tokens laid out batch-major (mathematically identical
    to the PyTorch seq-first layout: every op is per-(token,batch) or per-batch)."""
    d = x2d.shape[-1]
    # fused LN1 + QKV projection (bf16 output feeds the MXU)
    qkv = pallas_ln_linear_bias(x2d, p["ln1_g"], p["ln1_b"], p["w_qkv"], p["b_qkv"])
    # per-batch multi-head attention (all heads per grid step)
    attn = pallas_attention(qkv.reshape(B, L, 3 * d), heads)
    # fused out-projection + bias + residual add
    x2d = pallas_linear_bias_residual(attn.reshape(B * L, d),
                                      p["w_out"], p["b_out"], x2d)
    # fused LN2 + MLP + residual add
    x2d = pallas_ln_mlp_residual(x2d, p["ln2_g"], p["ln2_b"],
                                 p["w_fc"], p["b_fc"], p["w_proj"], p["b_proj"])
    return x2d


def vision_transformer_forward(x_nchw, prep, *, patch_size, heads):
    """x_nchw: (B, 3, R, R) f32 -> (B, output_dim) f32."""
    B, C, H, W = x_nchw.shape
    P = patch_size
    g = H // P
    width = prep["class_emb"].shape[0]

    # conv1 (stride == kernel == P, no bias) as patch extraction + matmul
    patches = x_nchw.reshape(B, C, g, P, g, P).transpose(0, 2, 4, 1, 3, 5)
    patches = patches.reshape(B * g * g, C * P * P)
    emb = pallas_linear(patches, prep["conv_w"]).reshape(B, g * g, width)

    # prepend class token, add positional embedding (one cheap XLA pass)
    cls = jnp.broadcast_to(prep["class_emb"].reshape(1, 1, width), (B, 1, width))
    x = jnp.concatenate([cls, emb], axis=1) + prep["pos_emb"]        # (B, L, width)
    L = g * g + 1

    # ln_pre
    x2d = pallas_layernorm(x.reshape(B * L, width), prep["ln_pre_g"], prep["ln_pre_b"])

    # transformer
    for blk in prep["blocks"]:
        x2d = residual_attention_block(x2d, blk, B=B, L=L, heads=heads)

    # ln_post on the CLS token fused with the final projection
    cls_tok = x2d.reshape(B, L, width)[:, 0, :]
    return pallas_ln_linear(cls_tok, prep["ln_post_g"], prep["ln_post_b"], prep["proj"])


# ----------------------------- Params -----------------------------

def init_params(key, *, width, layers, output_dim, patch_size, input_resolution, in_ch=3):
    """PyTorch-layout f32 parameters (linear weights are (out, in))."""
    grid = input_resolution // patch_size
    n_tok = grid * grid + 1
    keys = iter(jax.random.split(key, 8 + layers * 8))
    nxt = lambda: next(keys)
    scale = width ** (-0.5)

    def randn(k, shape, s=0.02):
        return s * jax.random.normal(k, shape, dtype=jnp.float32)

    params = {
        "conv_w": randn(nxt(), (width, in_ch, patch_size, patch_size)),
        "class_emb": scale * jax.random.normal(nxt(), (width,), dtype=jnp.float32),
        "pos_emb": scale * jax.random.normal(nxt(), (n_tok, width), dtype=jnp.float32),
        "ln_pre_g": jnp.ones((width,), jnp.float32),
        "ln_pre_b": jnp.zeros((width,), jnp.float32),
        "ln_post_g": jnp.ones((width,), jnp.float32),
        "ln_post_b": jnp.zeros((width,), jnp.float32),
        "proj": scale * jax.random.normal(nxt(), (width, output_dim), dtype=jnp.float32),
        "blocks": [],
    }
    for _ in range(layers):
        params["blocks"].append({
            "ln1_g": jnp.ones((width,), jnp.float32),
            "ln1_b": jnp.zeros((width,), jnp.float32),
            "ln2_g": jnp.ones((width,), jnp.float32),
            "ln2_b": jnp.zeros((width,), jnp.float32),
            "attn_in_w": randn(nxt(), (3 * width, width)),   # (out, in)
            "attn_in_b": randn(nxt(), (3 * width,)),
            "attn_out_w": randn(nxt(), (width, width)),
            "attn_out_b": randn(nxt(), (width,)),
            "fc_w": randn(nxt(), (4 * width, width)),
            "fc_b": randn(nxt(), (4 * width,)),
            "proj_w": randn(nxt(), (width, 4 * width)),
            "proj_b": randn(nxt(), (width,)),
        })
    return params


def prepare_params(params, *, in_ch, patch_size):
    """Transpose weights to (in, out) once and cast matmul weights to bf16
    (halves weight DMA bytes; biases / LN params / residual path stay f32)."""
    width = params["class_emb"].shape[0]

    def wT(w):
        return jnp.asarray(w).T.astype(jnp.bfloat16)

    prep = {
        "conv_w": wT(params["conv_w"].reshape(width, in_ch * patch_size * patch_size)),
        "class_emb": params["class_emb"],
        "pos_emb": params["pos_emb"],
        "ln_pre_g": params["ln_pre_g"], "ln_pre_b": params["ln_pre_b"],
        "ln_post_g": params["ln_post_g"], "ln_post_b": params["ln_post_b"],
        "proj": params["proj"].astype(jnp.bfloat16),
        "blocks": [],
    }
    for b in params["blocks"]:
        prep["blocks"].append({
            "ln1_g": b["ln1_g"], "ln1_b": b["ln1_b"],
            "ln2_g": b["ln2_g"], "ln2_b": b["ln2_b"],
            "w_qkv": wT(b["attn_in_w"]), "b_qkv": b["attn_in_b"],
            "w_out": wT(b["attn_out_w"]), "b_out": b["attn_out_b"],
            "w_fc": wT(b["fc_w"]), "b_fc": b["fc_b"],
            "w_proj": wT(b["proj_w"]), "b_proj": b["proj_b"],
        })
    return prep


# ----------------------------- Main -----------------------------

if __name__ == "__main__":
    # small config consistent with the module
    input_resolution = 16
    patch_size = 8
    width = 32
    layers = 2
    heads = 4
    output_dim = 16
    batch = 2
    in_ch = 3

    key = jax.random.PRNGKey(0)
    k_x, k_p = jax.random.split(key)

    params = init_params(k_p, width=width, layers=layers, output_dim=output_dim,
                         patch_size=patch_size, input_resolution=input_resolution,
                         in_ch=in_ch)
    prep = prepare_params(params, in_ch=in_ch, patch_size=patch_size)

    # input image batch, NCHW like the PyTorch Conv2d
    x = jax.random.normal(k_x, (batch, in_ch, input_resolution, input_resolution),
                          dtype=jnp.float32)

    out = vision_transformer_forward(x, prep, patch_size=patch_size, heads=heads)
    out = jax.block_until_ready(out)
    assert out.shape == (batch, output_dim), out.shape
    assert bool(jnp.all(jnp.isfinite(out)))
    print("KERNEL_OK")
</pallas_src>

<mosaic_0001>
module attributes {stable_mosaic.version = 11 : i64} {
  func.func @_linear_kernel(%arg0: i32, %arg1: memref<8x192xf32, #tpu.memory_space<vmem>>, %arg2: memref<192x32xbf16, #tpu.memory_space<vmem>>, %arg3: memref<8x32xf32, #tpu.memory_space<vmem>>) attributes {dimension_semantics = [#tpu.dimension_semantics<parallel>], iteration_bounds = array<i64: 1>, scalar_prefetch = 0 : i64, scratch_operands = 0 : i64, tpu.core_type = #tpu.core_type<tc>, window_params = [{transform_indices = @transform_0, window_bounds = array<i64: 8, 192>}, {pipeline_mode = #tpu.pipeline_mode<synchronous>, transform_indices = @transform_1, window_bounds = array<i64: 192, 32>}, {transform_indices = @transform_2, window_bounds = array<i64: 8, 32>}]} {
    %c0 = arith.constant 0 : index
    %c0_0 = arith.constant 0 : index
    %0 = vector.load %arg1[%c0, %c0_0] : memref<8x192xf32, #tpu.memory_space<vmem>>, vector<8x192xf32>
    %1 = arith.truncf %0 : vector<8x192xf32> to vector<8x192xbf16>
    %c0_1 = arith.constant 0 : index
    %c0_2 = arith.constant 0 : index
    %2 = vector.load %arg2[%c0_1, %c0_2] : memref<192x32xbf16, #tpu.memory_space<vmem>>, vector<192x32xbf16>
    %cst = arith.constant dense<0.000000e+00> : vector<8x32xf32>
    %3 = tpu.matmul %1, %2, %cst {dimension_numbers = #tpu.dot_dimension_numbers<[1], [0], [0], [1], [0, 0, 1, 1], [], []>} : vector<8x192xbf16>, vector<192x32xbf16>, vector<8x32xf32> -> vector<8x32xf32>
    %c0_3 = arith.constant 0 : index
    %c0_4 = arith.constant 0 : index
    %4 = vector.load %arg3[%c0_3, %c0_4] : memref<8x32xf32, #tpu.memory_space<vmem>>, vector<8x32xf32>
    tpu.vector_store %arg3[%c0_3, %c0_4], %3 {strides = array<i32>} : memref<8x32xf32, #tpu.memory_space<vmem>>, vector<8x32xf32>,
    return
  }
  func.func @transform_0(%arg0: i32) -> (i32, i32) {
    %c0_i32 = arith.constant 0 : i32
    %c0_i32_0 = arith.constant 0 : i32
    return %arg0, %c0_i32 : i32, i32
  }
  func.func @transform_1(%arg0: i32) -> (i32, i32) {
    %c0_i32 = arith.constant 0 : i32
    %c0_i32_0 = arith.constant 0 : i32
    %c0_i32_1 = arith.constant 0 : i32
    return %c0_i32, %c0_i32_0 : i32, i32
  }
  func.func @transform_2(%arg0: i32) -> (i32, i32) {
    %c0_i32 = arith.constant 0 : i32
    %c0_i32_0 = arith.constant 0 : i32
    return %arg0, %c0_i32 : i32, i32
  }
}

</mosaic_0001>

<bundles_post_ra>
// kernel: tpu_custom_call.1
= control target key start
LH: loop header
LB: loop body
LE: loop exit
PB: predicated region body
PF: predicated region fallthrough
CT: control target
= control target key end

     0   :  { %s310_s0 = inlined_call_operand.vmem [shape: f32[8,192], index: 0, kind: input, shape index: {}]   ;;  %s311_s1 = inlined_call_operand.vmem [shape: bf16[192,32], index: 1, kind: input, shape index: {}]   ;;  %s312_s2 = inlined_call_operand.hbm [shape: f32[8,32], index: 2, kind: output, shape index: {}]  }
   0x1   :  { %v217_v0 = vld [vmem:[%s311_s1 + $0x38] sm:$0xff]  ;;  %v216_v2 = vld [vmem:[%s311_s1 + $0x30] sm:$0xff] }
   0x2   :  { %v221_v1 = vld [vmem:[%s311_s1 + $0x58] sm:$0xff]  ;;  %117 = vmatpush.bf16.msra.mxu0 %v217_v0  ;;  %v220_v3 = vld [vmem:[%s311_s1 + $0x50] sm:$0xff] }
   0x3   :  { %134 = vmatpush.bf16.msra.mxu1 %v221_v1 }
   0x4   :  { %7 = vsyncpa [#allocation3], 0  ;;  %v215_v4 = vld [vmem:[%s311_s1 + $0x28] sm:$0xff]  ;;  %v214_v6 = vld [vmem:[%s311_s1 + $0x20] sm:$0xff]  ;;  %vm113_vm0 = vcmask 523264   ;;  %s249_s9 = smov [#allocation2]  }
   0x5   :  { %v219_v5 = vld [vmem:[%s311_s1 + $0x48] sm:$0xff]  ;;  %v218_v7 = vld [vmem:[%s311_s1 + $0x40] sm:$0xff]  ;;  %v213_v9 = vld [vmem:[%s311_s1 + $0x18] sm:$0xff]  ;;  %s150_s10 = sshll.u32 %s249_s9, 4  ;;  %s152_s13 = sshll.u32 %s312_s2, 4  ;;  %vm143_vm1 = vcmask 261120   ;;  %s151_s10 = int_to_ptr.vmem [resolvable:$true] %s150_s10  ;;  %s153_s13 = int_to_ptr.hbm [resolvable:$true] %s152_s13 }
   0x6   :  { %118 = vmatpush.bf16.msra.mxu0 %v216_v2  ;;  %v14_v8 = vld [vmem:[%s310_s0 + $0x8] sm:$0xff]  ;;  %v212_v11 = vld [vmem:[%s311_s1 + $0x10] sm:$0xff]  ;;  %v210_v13 = vld [vmem:[%s311_s1] sm:$0xff] }
   0x7   :  { %135 = vmatpush.bf16.msra.mxu1 %v220_v3  ;;  %v16_v10 = vpack.c.bf16 %v14_v8, %v14_v8  ;;  %v211_v12 = vld [vmem:[%s311_s1 + $0x8] sm:$0xff]  ;;  %v13_v14 = vld [vmem:[%s310_s0] sm:$0xff] }
   0x8   :  { %v15_v15 = vpack.c.bf16 %v13_v14, %v13_v14 }
   0xa   :  { %119 = vmatpush.bf16.msra.mxu0 %v215_v4 }
   0xb   :  { %136 = vmatpush.bf16.msra.mxu1 %v219_v5 }
   0xe   :  { %120 = vmatpush.bf16.msra.mxu0 %v214_v6 }
   0xf   :  { %137 = vmatpush.bf16.msra.mxu1 %v218_v7 }
  0x12   :  { %121 = vmatpush.bf16.msra.mxu0 %v213_v9  ;;  %209 = vmatmul.msk.bf16.vlgmr.msra.gmra.mxu1 %vm113_vm0, %v16_v10 }
  0x16   :  { %122 = vmatpush.bf16.msra.mxu0 %v212_v11 }
  0x1a   :  { %123 = vmatpush.bf16.msra.mxu0 %v211_v12 }
  0x1e   :  { %124 = vmatpush.bf16.msra.mxu0 %v210_v13 }
  0x21   :  { %125 = vmatmul.bf16.vlgmr.msra.gmra.mxu0 %v15_v15 }
  0x8f   :  { %v139_v16 = vpop.f32.mrf.mxu1 }
  0x97   :  { %v141_v17 = vpop.f32.mrf.mxu1 }
  0x9e   :  { %v126_v18 = vpop.f32.mrf.mxu0 }
  0x9f   :  { %v140_v19 = vadd.f32 %v139_v16, %v126_v18 }
  0xa1   :  { %144 = vst.msk [vmem:[#allocation2] sm:$0xff] %vm143_vm1, %v140_v19 }
  0xa2   :  { %155 = dma.vmem_to_hbm [thread:$0]  %s151_s10, 128, %s153_s13, [#allocation3]  }
  0xa6   :  { %v128_v20 = vpop.f32.mrf.mxu0 }
  0xa7   :  { %247 = dma.done.wait [#allocation3], 128  }
  0xa8   :  { %248 = vsyncadd [#allocation3], 4294967168 }
  0xa9   :  { %160 = vsyncpa [#allocation3], 1 }

</bundles_post_ra>
